<compile_context>
chip_gen: v7x
topology: tpu7x:2x2x1
jax: 0.10.0
libtpu: 0.0.40
codegen_flags: <defaults>
</compile_context>

<pallas_src>
import math

import jax
import jax.numpy as jnp
from jax.experimental import pallas as pl
from jax.experimental.pallas import tpu as pltpu

IN_DIM = 300
HID_DIM = 50
OUT_DIM = 10


def _log_softmax_rows(z):
    # numerically-stable log_softmax along last axis (torch dim=1)
    m = jnp.max(z, axis=-1, keepdims=True)
    shifted = z - m
    lse = jnp.log(jnp.sum(jnp.exp(shifted), axis=-1, keepdims=True))
    return shifted - lse


def multi_input_net_kernel(
    x1_ref, x2_ref,
    w1a_ref, b1a_ref, w1b_ref, b1b_ref,
    w2a_ref, b2a_ref, w2b_ref, b2b_ref,
    out_ref,
):
    # Hoist the (1, F) bias loads once per tile (kept in f32).
    b1a = b1a_ref[...]
    b1b = b1b_ref[...]
    b2a = b2a_ref[...]
    b2b = b2b_ref[...]

    mm_dtype = w1b_ref.dtype  # compute dtype for MXU inputs (f32 or bf16)

    # Branch 1: relu(x1 @ W1a + b1a) @ W1b + b1b   (f32 accumulation on MXU)
    h1 = jnp.dot(x1_ref[...], w1a_ref[...], preferred_element_type=jnp.float32)
    h1 = jnp.maximum(h1 + b1a, 0.0)
    y1 = jnp.dot(h1.astype(mm_dtype), w1b_ref[...],
                 preferred_element_type=jnp.float32) + b1b

    # Branch 2
    h2 = jnp.dot(x2_ref[...], w2a_ref[...], preferred_element_type=jnp.float32)
    h2 = jnp.maximum(h2 + b2a, 0.0)
    y2 = jnp.dot(h2.astype(mm_dtype), w2b_ref[...],
                 preferred_element_type=jnp.float32) + b2b

    # torch.cat((y1, y2), 0) then log_softmax(dim=1) is row-wise, so per-branch
    # log_softmax written into the (2, TM, 10) output block is equivalent.
    out_ref[0] = _log_softmax_rows(y1).astype(out_ref.dtype)
    out_ref[1] = _log_softmax_rows(y2).astype(out_ref.dtype)


def multi_input_net(x1, x2, params, *, block_rows=1024,
                    compute_dtype=jnp.float32):
    """params: w1a (300,50), b1a (1,50), w1b (50,10), b1b (1,10) + same for branch 2."""
    n, in_dim = x1.shape
    assert in_dim == IN_DIM

    cd = jnp.dtype(compute_dtype)
    x1c = x1.astype(cd)
    x2c = x2.astype(cd)
    w1a = params["w1a"].astype(cd)
    w1b = params["w1b"].astype(cd)
    w2a = params["w2a"].astype(cd)
    w2b = params["w2b"].astype(cd)
    # Biases stay f32: they are added after f32 accumulation.
    b1a = params["b1a"].astype(jnp.float32)
    b1b = params["b1b"].astype(jnp.float32)
    b2a = params["b2a"].astype(jnp.float32)
    b2b = params["b2b"].astype(jnp.float32)

    # Batch tile: full-extent block for small N (exempt from the 8-sublane rule),
    # otherwise a multiple of 8; the last (partial) block is masked by Pallas and
    # every op in the kernel is row-independent, so padding rows are harmless.
    if n <= block_rows:
        tm = n
    else:
        tm = max(8, (block_rows // 8) * 8)
    grid = (pl.cdiv(n, tm),)

    x_spec = pl.BlockSpec((tm, IN_DIM), lambda i: (i, 0))

    def resident(arr):
        # Full-array block with a constant index_map: DMA'd once, reused every step.
        return pl.BlockSpec(arr.shape, lambda i: (0,) * arr.ndim)

    out_spec = pl.BlockSpec((2, tm, OUT_DIM), lambda i: (0, i, 0))

    out = pl.pallas_call(
        multi_input_net_kernel,
        grid=grid,
        out_shape=jax.ShapeDtypeStruct((2, n, OUT_DIM), jnp.float32),
        in_specs=[
            x_spec, x_spec,
            resident(w1a), resident(b1a), resident(w1b), resident(b1b),
            resident(w2a), resident(b2a), resident(w2b), resident(b2b),
        ],
        out_specs=out_spec,
        compiler_params=pltpu.CompilerParams(
            dimension_semantics=("parallel",),   # shard batch tiles across v7x's 2 TCs
            vmem_limit_bytes=32 * 1024 * 1024,   # safe on v5e/v6e/v7x; TM=1024 uses ~6 MiB
        ),
    )(x1c, x2c, w1a, b1a, w1b, b1b, w2a, b2a, w2b, b2b)

    # (2, N, 10) -> (2N, 10): branch-1 rows then branch-2 rows == torch.cat(dim=0).
    return out.reshape(2 * n, OUT_DIM)


def init_params(key):
    """Deterministic init mimicking torch.nn.Linear default U[-1/sqrt(fan_in), +...]."""
    ks = jax.random.split(key, 8)

    def linear(kw, kb, fan_in, fan_out):
        bound = 1.0 / math.sqrt(fan_in)
        w = jax.random.uniform(kw, (fan_in, fan_out), jnp.float32, -bound, bound)
        b = jax.random.uniform(kb, (1, fan_out), jnp.float32, -bound, bound)
        return w, b

    w1a, b1a = linear(ks[0], ks[1], IN_DIM, HID_DIM)
    w1b, b1b = linear(ks[2], ks[3], HID_DIM, OUT_DIM)
    w2a, b2a = linear(ks[4], ks[5], IN_DIM, HID_DIM)
    w2b, b2b = linear(ks[6], ks[7], HID_DIM, OUT_DIM)
    return dict(w1a=w1a, b1a=b1a, w1b=w1b, b1b=b1b,
                w2a=w2a, b2a=b2a, w2b=w2b, b2b=b2b)


def reference(x1, x2, p):
    h1 = jax.nn.relu(x1 @ p["w1a"] + p["b1a"])
    y1 = h1 @ p["w1b"] + p["b1b"]
    h2 = jax.nn.relu(x2 @ p["w2a"] + p["b2a"])
    y2 = h2 @ p["w2b"] + p["b2b"]
    y = jnp.concatenate([y1, y2], axis=0)
    return jax.nn.log_softmax(y, axis=1)


if __name__ == "__main__":
    key = jax.random.PRNGKey(0)
    k_p, k_x1, k_x2 = jax.random.split(key, 3)
    params = init_params(k_p)

    # 1) Small smoke test (single grid step), f32, tight tolerance.
    N = 2
    x1 = jax.random.normal(k_x1, (N, IN_DIM), jnp.float32)
    x2 = jax.random.normal(k_x2, (N, IN_DIM), jnp.float32)
    out = jax.block_until_ready(multi_input_net(x1, x2, params))
    ref = reference(x1, x2, params)
    assert out.shape == (2 * N, OUT_DIM)
    assert jnp.allclose(out, ref, atol=1e-5, rtol=1e-5), "f32 small-N mismatch"

    # 2) Multi-tile grid with a partial last block (130 = 2*64 + 2 rows), f32.
    N2 = 130
    x1b = jax.random.normal(jax.random.PRNGKey(1), (N2, IN_DIM), jnp.float32)
    x2b = jax.random.normal(jax.random.PRNGKey(2), (N2, IN_DIM), jnp.float32)
    ref2 = reference(x1b, x2b, params)
    out2 = jax.block_until_ready(multi_input_net(x1b, x2b, params, block_rows=64))
    assert out2.shape == (2 * N2, OUT_DIM)
    assert jnp.allclose(out2, ref2, atol=1e-5, rtol=1e-5), "f32 tiled mismatch"

    # 3) bf16 compute path (halves HBM traffic); f32 accumulation, looser tolerance.
    out3 = jax.block_until_ready(
        multi_input_net(x1b, x2b, params, block_rows=64,
                        compute_dtype=jnp.bfloat16))
    assert jnp.allclose(out3, ref2, atol=5e-2, rtol=5e-2), "bf16 tiled mismatch"

    print("KERNEL_OK")
</pallas_src>

<mosaic_0001>
module attributes {stable_mosaic.version = 11 : i64} {
  func.func @multi_input_net_kernel(%arg0: i32, %arg1: memref<2x300xf32, #tpu.memory_space<vmem>>, %arg2: memref<2x300xf32, #tpu.memory_space<vmem>>, %arg3: memref<300x50xf32, #tpu.memory_space<vmem>>, %arg4: memref<1x50xf32, #tpu.memory_space<vmem>>, %arg5: memref<50x10xf32, #tpu.memory_space<vmem>>, %arg6: memref<1x10xf32, #tpu.memory_space<vmem>>, %arg7: memref<300x50xf32, #tpu.memory_space<vmem>>, %arg8: memref<1x50xf32, #tpu.memory_space<vmem>>, %arg9: memref<50x10xf32, #tpu.memory_space<vmem>>, %arg10: memref<1x10xf32, #tpu.memory_space<vmem>>, %arg11: memref<2x2x10xf32, #tpu.memory_space<vmem>>) attributes {dimension_semantics = [#tpu.dimension_semantics<parallel>], iteration_bounds = array<i64: 1>, scalar_prefetch = 0 : i64, scratch_operands = 0 : i64, tpu.core_type = #tpu.core_type<tc>, window_params = [{transform_indices = @transform_0, window_bounds = array<i64: 2, 300>}, {transform_indices = @transform_1, window_bounds = array<i64: 2, 300>}, {pipeline_mode = #tpu.pipeline_mode<synchronous>, transform_indices = @transform_2, window_bounds = array<i64: 300, 50>}, {pipeline_mode = #tpu.pipeline_mode<synchronous>, transform_indices = @transform_3, window_bounds = array<i64: 1, 50>}, {pipeline_mode = #tpu.pipeline_mode<synchronous>, transform_indices = @transform_4, window_bounds = array<i64: 50, 10>}, {pipeline_mode = #tpu.pipeline_mode<synchronous>, transform_indices = @transform_5, window_bounds = array<i64: 1, 10>}, {pipeline_mode = #tpu.pipeline_mode<synchronous>, transform_indices = @transform_6, window_bounds = array<i64: 300, 50>}, {pipeline_mode = #tpu.pipeline_mode<synchronous>, transform_indices = @transform_7, window_bounds = array<i64: 1, 50>}, {pipeline_mode = #tpu.pipeline_mode<synchronous>, transform_indices = @transform_8, window_bounds = array<i64: 50, 10>}, {pipeline_mode = #tpu.pipeline_mode<synchronous>, transform_indices = @transform_9, window_bounds = array<i64: 1, 10>}, {transform_indices = @transform_10, window_bounds = array<i64: 2, 2, 10>}]} {
    %c0 = arith.constant 0 : index
    %c0_0 = arith.constant 0 : index
    %0 = vector.load %arg4[%c0, %c0_0] : memref<1x50xf32, #tpu.memory_space<vmem>>, vector<1x50xf32>
    %c0_1 = arith.constant 0 : index
    %c0_2 = arith.constant 0 : index
    %1 = vector.load %arg6[%c0_1, %c0_2] : memref<1x10xf32, #tpu.memory_space<vmem>>, vector<1x10xf32>
    %c0_3 = arith.constant 0 : index
    %c0_4 = arith.constant 0 : index
    %2 = vector.load %arg8[%c0_3, %c0_4] : memref<1x50xf32, #tpu.memory_space<vmem>>, vector<1x50xf32>
    %c0_5 = arith.constant 0 : index
    %c0_6 = arith.constant 0 : index
    %3 = vector.load %arg10[%c0_5, %c0_6] : memref<1x10xf32, #tpu.memory_space<vmem>>, vector<1x10xf32>
    %c0_7 = arith.constant 0 : index
    %c0_8 = arith.constant 0 : index
    %4 = vector.load %arg1[%c0_7, %c0_8] : memref<2x300xf32, #tpu.memory_space<vmem>>, vector<2x300xf32>
    %c0_9 = arith.constant 0 : index
    %c0_10 = arith.constant 0 : index
    %5 = vector.load %arg3[%c0_9, %c0_10] : memref<300x50xf32, #tpu.memory_space<vmem>>, vector<300x50xf32>
    %cst = arith.constant dense<0.000000e+00> : vector<2x50xf32>
    %6 = tpu.matmul %4, %5, %cst {dimension_numbers = #tpu.dot_dimension_numbers<[1], [0], [0], [1], [0, 0, 1, 1], [], []>} : vector<2x300xf32>, vector<300x50xf32>, vector<2x50xf32> -> vector<2x50xf32>
    %7 = vector.broadcast %0 : vector<1x50xf32> to vector<2x50xf32>
    %8 = arith.addf %6, %7 : vector<2x50xf32>
    %cst_11 = arith.constant 0.000000e+00 : f32
    %9 = vector.broadcast %cst_11 : f32 to vector<2x50xf32>
    %10 = arith.maximumf %8, %9 : vector<2x50xf32>
    %c0_12 = arith.constant 0 : index
    %c0_13 = arith.constant 0 : index
    %11 = vector.load %arg5[%c0_12, %c0_13] : memref<50x10xf32, #tpu.memory_space<vmem>>, vector<50x10xf32>
    %cst_14 = arith.constant dense<0.000000e+00> : vector<2x10xf32>
    %12 = tpu.matmul %10, %11, %cst_14 {dimension_numbers = #tpu.dot_dimension_numbers<[1], [0], [0], [1], [0, 0, 1, 1], [], []>} : vector<2x50xf32>, vector<50x10xf32>, vector<2x10xf32> -> vector<2x10xf32>
    %13 = vector.broadcast %1 : vector<1x10xf32> to vector<2x10xf32>
    %14 = arith.addf %12, %13 : vector<2x10xf32>
    %c0_15 = arith.constant 0 : index
    %c0_16 = arith.constant 0 : index
    %15 = vector.load %arg2[%c0_15, %c0_16] : memref<2x300xf32, #tpu.memory_space<vmem>>, vector<2x300xf32>
    %c0_17 = arith.constant 0 : index
    %c0_18 = arith.constant 0 : index
    %16 = vector.load %arg7[%c0_17, %c0_18] : memref<300x50xf32, #tpu.memory_space<vmem>>, vector<300x50xf32>
    %cst_19 = arith.constant dense<0.000000e+00> : vector<2x50xf32>
    %17 = tpu.matmul %15, %16, %cst_19 {dimension_numbers = #tpu.dot_dimension_numbers<[1], [0], [0], [1], [0, 0, 1, 1], [], []>} : vector<2x300xf32>, vector<300x50xf32>, vector<2x50xf32> -> vector<2x50xf32>
    %18 = vector.broadcast %2 : vector<1x50xf32> to vector<2x50xf32>
    %19 = arith.addf %17, %18 : vector<2x50xf32>
    %cst_20 = arith.constant 0.000000e+00 : f32
    %20 = vector.broadcast %cst_20 : f32 to vector<2x50xf32>
    %21 = arith.maximumf %19, %20 : vector<2x50xf32>
    %c0_21 = arith.constant 0 : index
    %c0_22 = arith.constant 0 : index
    %22 = vector.load %arg9[%c0_21, %c0_22] : memref<50x10xf32, #tpu.memory_space<vmem>>, vector<50x10xf32>
    %cst_23 = arith.constant dense<0.000000e+00> : vector<2x10xf32>
    %23 = tpu.matmul %21, %22, %cst_23 {dimension_numbers = #tpu.dot_dimension_numbers<[1], [0], [0], [1], [0, 0, 1, 1], [], []>} : vector<2x50xf32>, vector<50x10xf32>, vector<2x10xf32> -> vector<2x10xf32>
    %24 = vector.broadcast %3 : vector<1x10xf32> to vector<2x10xf32>
    %25 = arith.addf %23, %24 : vector<2x10xf32>
    %cst_24 = arith.constant dense<0xFF800000> : vector<2xf32>
    %26 = vector.multi_reduction <maximumf>, %14, %cst_24 [1] : vector<2x10xf32> to vector<2xf32>
    %27 = vector.shape_cast %26 : vector<2xf32> to vector<2x1xf32>
    %28 = vector.broadcast %27 : vector<2x1xf32> to vector<2x10xf32>
    %29 = arith.subf %14, %28 : vector<2x10xf32>
    %30 = math.exp %29 : vector<2x10xf32>
    %cst_25 = arith.constant dense<0.000000e+00> : vector<2xf32>
    %31 = vector.multi_reduction <add>, %30, %cst_25 [1] : vector<2x10xf32> to vector<2xf32>
    %32 = vector.shape_cast %31 : vector<2xf32> to vector<2x1xf32>
    %33 = math.log %32 : vector<2x1xf32>
    %34 = vector.broadcast %33 : vector<2x1xf32> to vector<2x10xf32>
    %35 = arith.subf %29, %34 : vector<2x10xf32>
    %c0_26 = arith.constant 0 : index
    %c0_27 = arith.constant 0 : index
    %c0_28 = arith.constant 0 : index
    %36 = vector.load %arg11[%c0_26, %c0_27, %c0_28] : memref<2x2x10xf32, #tpu.memory_space<vmem>>, vector<1x2x10xf32>
    %37 = vector.shape_cast %36 : vector<1x2x10xf32> to vector<2x10xf32>
    %38 = vector.shape_cast %35 : vector<2x10xf32> to vector<1x2x10xf32>
    tpu.vector_store %arg11[%c0_26, %c0_27, %c0_28], %38 {strides = array<i32>} : memref<2x2x10xf32, #tpu.memory_space<vmem>>, vector<1x2x10xf32>,
    %cst_29 = arith.constant dense<0xFF800000> : vector<2xf32>
    %39 = vector.multi_reduction <maximumf>, %25, %cst_29 [1] : vector<2x10xf32> to vector<2xf32>
    %40 = vector.shape_cast %39 : vector<2xf32> to vector<2x1xf32>
    %41 = vector.broadcast %40 : vector<2x1xf32> to vector<2x10xf32>
    %42 = arith.subf %25, %41 : vector<2x10xf32>
    %43 = math.exp %42 : vector<2x10xf32>
    %cst_30 = arith.constant dense<0.000000e+00> : vector<2xf32>
    %44 = vector.multi_reduction <add>, %43, %cst_30 [1] : vector<2x10xf32> to vector<2xf32>
    %45 = vector.shape_cast %44 : vector<2xf32> to vector<2x1xf32>
    %46 = math.log %45 : vector<2x1xf32>
    %47 = vector.broadcast %46 : vector<2x1xf32> to vector<2x10xf32>
    %48 = arith.subf %42, %47 : vector<2x10xf32>
    %c1 = arith.constant 1 : index
    %c0_31 = arith.constant 0 : index
    %c0_32 = arith.constant 0 : index
    %49 = vector.load %arg11[%c1, %c0_31, %c0_32] : memref<2x2x10xf32, #tpu.memory_space<vmem>>, vector<1x2x10xf32>
    %50 = vector.shape_cast %49 : vector<1x2x10xf32> to vector<2x10xf32>
    %51 = vector.shape_cast %48 : vector<2x10xf32> to vector<1x2x10xf32>
    tpu.vector_store %arg11[%c1, %c0_31, %c0_32], %51 {strides = array<i32>} : memref<2x2x10xf32, #tpu.memory_space<vmem>>, vector<1x2x10xf32>,
    return
  }
  func.func @transform_0(%arg0: i32) -> (i32, i32) {
    %c0_i32 = arith.constant 0 : i32
    %c0_i32_0 = arith.constant 0 : i32
    return %arg0, %c0_i32 : i32, i32
  }
  func.func @transform_1(%arg0: i32) -> (i32, i32) {
    %c0_i32 = arith.constant 0 : i32
    %c0_i32_0 = arith.constant 0 : i32
    return %arg0, %c0_i32 : i32, i32
  }
  func.func @transform_2(%arg0: i32) -> (i32, i32) {
    %c0_i32 = arith.constant 0 : i32
    %c0_i32_0 = arith.constant 0 : i32
    %c0_i32_1 = arith.constant 0 : i32
    return %c0_i32, %c0_i32_0 : i32, i32
  }
  func.func @transform_3(%arg0: i32) -> (i32, i32) {
    %c0_i32 = arith.constant 0 : i32
    %c0_i32_0 = arith.constant 0 : i32
    %c0_i32_1 = arith.constant 0 : i32
    return %c0_i32, %c0_i32_0 : i32, i32
  }
  func.func @transform_4(%arg0: i32) -> (i32, i32) {
    %c0_i32 = arith.constant 0 : i32
    %c0_i32_0 = arith.constant 0 : i32
    %c0_i32_1 = arith.constant 0 : i32
    return %c0_i32, %c0_i32_0 : i32, i32
  }
  func.func @transform_5(%arg0: i32) -> (i32, i32) {
    %c0_i32 = arith.constant 0 : i32
    %c0_i32_0 = arith.constant 0 : i32
    %c0_i32_1 = arith.constant 0 : i32
    return %c0_i32, %c0_i32_0 : i32, i32
  }
  func.func @transform_6(%arg0: i32) -> (i32, i32) {
    %c0_i32 = arith.constant 0 : i32
    %c0_i32_0 = arith.constant 0 : i32
    %c0_i32_1 = arith.constant 0 : i32
    return %c0_i32, %c0_i32_0 : i32, i32
  }
  func.func @transform_7(%arg0: i32) -> (i32, i32) {
    %c0_i32 = arith.constant 0 : i32
    %c0_i32_0 = arith.constant 0 : i32
    %c0_i32_1 = arith.constant 0 : i32
    return %c0_i32, %c0_i32_0 : i32, i32
  }
  func.func @transform_8(%arg0: i32) -> (i32, i32) {
    %c0_i32 = arith.constant 0 : i32
    %c0_i32_0 = arith.constant 0 : i32
    %c0_i32_1 = arith.constant 0 : i32
    return %c0_i32, %c0_i32_0 : i32, i32
  }
  func.func @transform_9(%arg0: i32) -> (i32, i32) {
    %c0_i32 = arith.constant 0 : i32
    %c0_i32_0 = arith.constant 0 : i32
    %c0_i32_1 = arith.constant 0 : i32
    return %c0_i32, %c0_i32_0 : i32, i32
  }
  func.func @transform_10(%arg0: i32) -> (i32, i32, i32) {
    %c0_i32 = arith.constant 0 : i32
    %c0_i32_0 = arith.constant 0 : i32
    %c0_i32_1 = arith.constant 0 : i32
    return %c0_i32, %arg0, %c0_i32_0 : i32, i32, i32
  }
}

</mosaic_0001>

<bundles_post_ra>
// kernel: tpu_custom_call.1
= control target key start
LH: loop header
LB: loop body
LE: loop exit
PB: predicated region body
PF: predicated region fallthrough
CT: control target
= control target key end

     0   :  { %v1006_v7 = vmov 0.0|0.0   ;;  %v1007_v8 = vmov 1983009808   ;;  %v90_v10 = vlaneseq  ;;  %vm1008_vm0 = vmmov 0   ;;  %s1422_s0 = inlined_call_operand.vmem [shape: f32[2,300], index: 0, kind: input, shape index: {}]   ;;  %s1423_s1 = inlined_call_operand.vmem [shape: f32[2,300], index: 1, kind: input, shape index: {}]   ;;  %s1424_s2 = inlined_call_operand.vmem [shape: f32[300,50], index: 2, kind: input, shape index: {}]   ;;  %s1425_s3 = inlined_call_operand.vmem [shape: f32[1,50], index: 3, kind: input, shape index: {}]   ;;  %s1426_s4 = inlined_call_operand.vmem [shape: f32[50,10], index: 4, kind: input, shape index: {}]   ;;  %s1427_s5 = inlined_call_operand.vmem [shape: f32[1,10], index: 5, kind: input, shape index: {}]   ;;  %s1428_s6 = inlined_call_operand.vmem [shape: f32[300,50], index: 6, kind: input, shape index: {}]   ;;  %s1429_s7 = inlined_call_operand.vmem [shape: f32[1,50], index: 7, kind: input, shape index: {}]   ;;  %s1430_s8 = inlined_call_operand.vmem [shape: f32[50,10], index: 8, kind: input, shape index: {}]   ;;  %s1431_s9 = inlined_call_operand.vmem [shape: f32[1,10], index: 9, kind: input, shape index: {}]   ;;  %s1432_s10 = inlined_call_operand.hbm [shape: f32[2,2,10], index: 10, kind: output, shape index: {}]  }
   0x1   :  { %v57_v0 = vld [vmem:[%s1424_s2 + $0x80] sm:$0xff]  ;;  %v58_v1 = vld [vmem:[%s1424_s2 + $0x88] sm:$0xff]  ;;  %v59_v5 = vld [vmem:[%s1424_s2 + $0x90] sm:$0xff]  ;;  %894 = vmatprep.subr.bf16.mxu1 %v1006_v7  ;;  %v88_v9 = vunpack.c.l.s4 %v1007_v8  ;;  %v1009_v18 = vmov 0.0   ;;  %vm107_vm1 = vcmask 1043456  }
   0x2   :  { %v41_v2 = vld [vmem:[%s1424_s2] sm:$0xff]  ;;  %v862_v3 = vpack.c.bf16 %v58_v1, %v57_v0  ;;  %v42_v4 = vld [vmem:[%s1424_s2 + $0x8] sm:$0xff]  ;;  %v60_v6 = vld [vmem:[%s1424_s2 + $0x98] sm:$0xff]  ;;  %810 = vmatprep.mubr.msk.f32.mxu1 %vm1008_vm0, %v1009_v18  ;;  %v91_v23 = vshrl.u32 %v90_v10, 7 }
   0x3   :  { %v864_v11 = vpack.c.bf16 %v42_v4, %v41_v2  ;;  %v866_v12 = vpack.c.bf16 %v60_v6, %v59_v5  ;;  %v43_v13 = vld [vmem:[%s1424_s2 + $0x10] sm:$0xff]  ;;  %v44_v14 = vld [vmem:[%s1424_s2 + $0x18] sm:$0xff]  ;;  %v61_v15 = vld [vmem:[%s1424_s2 + $0xa0] sm:$0xff]  ;;  %v89_v22 = vunpack.c.0.s8 %v88_v9 }
   0x4   :  { %863 = vmatprep.subr.bf16.mxu0 %v862_v3  ;;  %v62_v16 = vld [vmem:[%s1424_s2 + $0xa8] sm:$0xff]  ;;  %v868_v17 = vpack.c.bf16 %v44_v14, %v43_v13  ;;  %v45_v20 = vld [vmem:[%s1424_s2 + $0x20] sm:$0xff]  ;;  %v63_v24 = vld [vmem:[%s1424_s2 + $0xb0] sm:$0xff] }
   0x5   :  { %865 = vmatpush3.bf16.msra.mxu0 %v864_v11  ;;  %v870_v19 = vpack.c.bf16 %v62_v16, %v61_v15  ;;  %v46_v21 = vld [vmem:[%s1424_s2 + $0x28] sm:$0xff]  ;;  %v64_v25 = vld [vmem:[%s1424_s2 + $0xb8] sm:$0xff]  ;;  %v47_v27 = vld [vmem:[%s1424_s2 + $0x30] sm:$0xff]  ;;  %v1126_v32 = vsub.s32 %v89_v22, %v91_v23 }
   0x6   :  { %867 = vmatprep.subr.bf16.mxu0 %v866_v12  ;;  %v872_v26 = vpack.c.bf16 %v46_v21, %v45_v20  ;;  %v874_v28 = vpack.c.bf16 %v64_v25, %v63_v24  ;;  %v48_v29 = vld [vmem:[%s1424_s2 + $0x38] sm:$0xff]  ;;  %v73_v30 = vld [vmem:[%s1424_s2 + $0x100] sm:$0xff]  ;;  %v74_v31 = vld [vmem:[%s1424_s2 + $0x108] sm:$0xff] }
   0x7   :  { %v65_v33 = vld [vmem:[%s1424_s2 + $0xc0] sm:$0xff]  ;;  %v66_v34 = vld [vmem:[%s1424_s2 + $0xc8] sm:$0xff]  ;;  %v895_v35 = vpack.c.bf16 %v74_v31, %v73_v30  ;;  %v75_v36 = vld [vmem:[%s1424_s2 + $0x110] sm:$0xff]  ;;  %v876_v38 = vpack.c.bf16 %v48_v29, %v47_v27 }
   0x8   :  { %v76_v37 = vld [vmem:[%s1424_s2 + $0x118] sm:$0xff]  ;;  %v49_v39 = vld [vmem:[%s1424_s2 + $0x40] sm:$0xff]  ;;  %v878_v42 = vpack.c.bf16 %v66_v34, %v65_v33  ;;  %v50_v43 = vld [vmem:[%s1424_s2 + $0x48] sm:$0xff] }
   0x9   :  { %869 = vmatpush3.bf16.msra.mxu0 %v868_v17  ;;  %896 = vmatpush3.bf16.msra.mxu1 %v895_v35  ;;  %v898_v40 = vpack.c.bf16 %v76_v37, %v75_v36  ;;  %v40_v41 = vld [vmem:[%s1422_s0] sm:$0x3f]  ;;  %v78_v46 = vld [vmem:[%s1424_s2 + $0x128] sm:$0xf]  ;;  %v67_v47 = vld [vmem:[%s1424_s2 + $0xd0] sm:$0xff] }
   0xa   :  { %871 = vmatprep.subr.bf16.mxu0 %v870_v19  ;;  %897 = vmatprep.subr.bf16.mxu1 %v1006_v7  ;;  %v93_v44 = vrot.slane %v40_v41, %v1126_v32  ;;  %v77_v45 = vld [vmem:[%s1424_s2 + $0x120] sm:$0xff]  ;;  %v68_v48 = vld [vmem:[%s1424_s2 + $0xd8] sm:$0xff] }
   0xd   :  { %873 = vmatpush3.bf16.msra.mxu0 %v872_v26 }
   0xe   :  { %875 = vmatprep.subr.bf16.mxu0 %v874_v28 }
   0xf   :  { %15 = vsyncpa [#allocation3], 0  ;;  %v86_v49 = vcombine.high %v40_v41, %v40_v41  ;;  %v101_v50 = vcombine.high %v93_v44, %v93_v44  ;;  %v880_v51 = vpack.c.bf16 %v50_v43, %v49_v39  ;;  %v51_v52 = vld [vmem:[%s1424_s2 + $0x50] sm:$0xff]  ;;  %v52_v53 = vld [vmem:[%s1424_s2 + $0x58] sm:$0xff]  ;;  %899 = vmatpush3.bf16.msra.mxu1 %v898_v40  ;;  %v901_v54 = vpack.c.bf16 %v78_v46, %v77_v45 }
  0x10   :  { %v882_v55 = vpack.c.bf16 %v68_v48, %v67_v47  ;;  %vm1010_vm2 = vmmov 1   ;;  %v252_v57 = vld [vmem:[%s1426_s4] sm:$0xff]  ;;  %v253_v58 = vld [vmem:[%s1426_s4 + $0x8] sm:$0xff]  ;;  %900 = vmatprep.subr.bf16.mxu1 %v1006_v7  ;;  %v884_v62 = vpack.c.bf16 %v52_v53, %v51_v52  ;;  %vm104_vm4 = vcmask 359424   ;;  %v71_v3 = vld [vmem:[%s1424_s2 + $0xf0] sm:$0xff] }
  0x11   :  { %877 = vmatpush3.bf16.msra.mxu0 %v876_v38  ;;  %175 = vmatprep.mubr.f32.mxu0 %v101_v50  ;;  %vm1169_vm3 = vmpackc.low %vm107_vm1, %vm1010_vm2  ;;  %v69_v59 = vld [vmem:[%s1424_s2 + $0xe0] sm:$0xff]  ;;  %v70_v60 = vld [vmem:[%s1424_s2 + $0xe8] sm:$0xff]  ;;  %v100_v61 = vrot.slane %v86_v49, %v1126_v32  ;;  %v905_v63 = vpack.c.bf16 %v253_v58, %v252_v57  ;;  %vm269_vm5 = vcmask 1041408   ;;  %vm265_vm6 = vcmask 408576  }
  0x12   :  { %879 = vmatprep.subr.bf16.mxu0 %v878_v42  ;;  %v886_v0 = vpack.c.bf16 %v70_v60, %v69_v59  ;;  %v53_v1 = vld [vmem:[%s1424_s2 + $0x60] sm:$0xff]  ;;  %v54_v2 = vld [vmem:[%s1424_s2 + $0x68] sm:$0xff]  ;;  %v72_v4 = vld [vmem:[%s1424_s2 + $0xf8] sm:$0xff]  ;;  %vm642_vm7 = vcmask 74752  }
  0x13   :  { %903 = vmatpush3.bf16.msk.msra.mxu1 %vm1169_vm3, %v901_v54  ;;  %v888_v5 = vpack.c.bf16 %v54_v2, %v53_v1  ;;  %v890_v6 = vpack.c.bf16 %v72_v4, %v71_v3  ;;  %v55_v8 = vld [vmem:[%s1424_s2 + $0x70] sm:$0xff]  ;;  %v56_v9 = vld [vmem:[%s1424_s2 + $0x78] sm:$0xff]  ;;  %v256_v14 = vld [vmem:[%s1426_s4 + $0x20] sm:$0xff] }
  0x14   :  { %904 = vmatprep.subr.bf16.mxu1 %v1006_v7  ;;  %v892_v10 = vpack.c.bf16 %v56_v9, %v55_v8  ;;  %v254_v11 = vld [vmem:[%s1426_s4 + $0x10] sm:$0xff]  ;;  %v255_v12 = vld [vmem:[%s1426_s4 + $0x18] sm:$0xff]  ;;  %v257_v15 = vld [vmem:[%s1426_s4 + $0x28] sm:$0xff] }
  0x15   :  { %881 = vmatpush3.bf16.msra.mxu0 %v880_v51  ;;  %v908_v13 = vpack.c.bf16 %v255_v12, %v254_v11  ;;  %v911_v16 = vpack.c.bf16 %v257_v15, %v256_v14  ;;  %v360_v17 = vld [vmem:[%s1428_s6 + $0x80] sm:$0xff]  ;;  %v361_v19 = vld [vmem:[%s1428_s6 + $0x88] sm:$0xff]  ;;  %v258_v20 = vld [vmem:[%s1426_s4 + $0x30] sm:$0x3] }
  0x16   :  { %883 = vmatprep.subr.bf16.mxu0 %v882_v55  ;;  %811 = vmatmul.mubr.msk.f32.vlgmr.msra.gmra.mrb[0].mxu1 %vm104_vm4, %v100_v61  ;;  %v913_v21 = vpack.c.bf16 %v361_v19, %v360_v17  ;;  %v376_v22 = vld [vmem:[%s1428_s6 + $0x100] sm:$0xff]  ;;  %v377_v23 = vld [vmem:[%s1428_s6 + $0x108] sm:$0xff]  ;;  %v378_v25 = vld [vmem:[%s1428_s6 + $0x110] sm:$0xff] }
  0x17   :  { %906 = vmatpush3.bf16.msra.mxu1 %v905_v63  ;;  %827 = vmatprep.mubr.msk.f32.mxu1 %vm1008_vm0, %v1009_v18  ;;  %v946_v24 = vpack.c.bf16 %v377_v23, %v376_v22  ;;  %v379_v26 = vld [vmem:[%s1428_s6 + $0x118] sm:$0xff]  ;;  %v343_v28 = vld [vmem:[%s1423_s1] sm:$0x3f]  ;;  %v381_v31 = vld [vmem:[%s1428_s6 + $0x128] sm:$0xf] }
  0x18   :  { %907 = vmatprep.subr.bf16.mxu1 %v1006_v7  ;;  %v949_v27 = vpack.c.bf16 %v379_v26, %v378_v25  ;;  %v389_v29 = vcombine.high %v343_v28, %v343_v28  ;;  %v380_v30 = vld [vmem:[%s1428_s6 + $0x120] sm:$0xff]  ;;  %v1273_v41 = vrot.slane %v343_v28, %v1126_v32  ;;  %v362_v45 = vld [vmem:[%s1428_s6 + $0x90] sm:$0xff]  ;;  %v363_v46 = vld [vmem:[%s1428_s6 + $0x98] sm:$0xff] }
  0x19   :  { %885 = vmatpush3.bf16.msra.mxu0 %v884_v62  ;;  %v952_v33 = vpack.c.bf16 %v381_v31, %v380_v30  ;;  %v686_v39 = vld [vmem:[%s1425_s3] ss:$0 sm:$0xff]  ;;  %v917_v50 = vpack.c.bf16 %v363_v46, %v362_v45  ;;  %v346_v51 = vld [vmem:[%s1428_s6 + $0x10] sm:$0xff]  ;;  %v347_v52 = vld [vmem:[%s1428_s6 + $0x18] sm:$0xff] }
  0x1a   :  { %887 = vmatprep.subr.bf16.mxu0 %v886_v0  ;;  %v403_v34 = vrot.slane %v389_v29, %v1126_v32  ;;  %v344_v43 = vld [vmem:[%s1428_s6] sm:$0xff]  ;;  %v404_v48 = vcombine.high %v1273_v41, %v1273_v41  ;;  %v365_v54 = vld [vmem:[%s1428_s6 + $0xa8] sm:$0xff]  ;;  %v919_v55 = vpack.c.bf16 %v347_v52, %v346_v51  ;;  %v366_v59 = vld [vmem:[%s1428_s6 + $0xb0] sm:$0xff] }
  0x1b   :  { %909 = vmatpush3.bf16.msra.mxu1 %v908_v13  ;;  %v364_v53 = vld [vmem:[%s1428_s6 + $0xa0] sm:$0xff]  ;;  %v349_v58 = vld [vmem:[%s1428_s6 + $0x28] sm:$0xff]  ;;  %v367_v60 = vld [vmem:[%s1428_s6 + $0xb8] sm:$0xff] }
  0x1c   :  { %910 = vmatprep.subr.bf16.mxu1 %v1006_v7  ;;  %v921_v56 = vpack.c.bf16 %v365_v54, %v364_v53  ;;  %v348_v57 = vld [vmem:[%s1428_s6 + $0x20] sm:$0xff]  ;;  %v925_v62 = vpack.c.bf16 %v367_v60, %v366_v59  ;;  %v350_v63 = vld [vmem:[%s1428_s6 + $0x30] sm:$0xff]  ;;  %v351_v0 = vld [vmem:[%s1428_s6 + $0x38] sm:$0xff] }
  0x1d   :  { %889 = vmatpush3.bf16.msra.mxu0 %v888_v5  ;;  %v923_v61 = vpack.c.bf16 %v349_v58, %v348_v57  ;;  %v368_v1 = vld [vmem:[%s1428_s6 + $0xc0] sm:$0xff]  ;;  %v369_v2 = vld [vmem:[%s1428_s6 + $0xc8] sm:$0xff]  ;;  %v927_v3 = vpack.c.bf16 %v351_v0, %v350_v63  ;;  %v370_v8 = vld [vmem:[%s1428_s6 + $0xd0] sm:$0xff] }
  0x1e   :  { %891 = vmatprep.subr.bf16.mxu0 %v890_v6  ;;  %v929_v4 = vpack.c.bf16 %v369_v2, %v368_v1  ;;  %v352_v5 = vld [vmem:[%s1428_s6 + $0x40] sm:$0xff]  ;;  %v353_v6 = vld [vmem:[%s1428_s6 + $0x48] sm:$0xff]  ;;  %v371_v9 = vld [vmem:[%s1428_s6 + $0xd8] sm:$0xff] }
  0x1f   :  { %912 = vmatpush3.bf16.msra.mxu1 %v911_v16  ;;  %v933_v11 = vpack.c.bf16 %v371_v9, %v370_v8  ;;  %v354_v12 = vld [vmem:[%s1428_s6 + $0x50] sm:$0xff]  ;;  %v355_v13 = vld [vmem:[%s1428_s6 + $0x58] sm:$0xff]  ;;  %v372_v14 = vld [vmem:[%s1428_s6 + $0xe0] sm:$0xff] }
  0x20   :  { %825 = vmatprep.subr.mxu1 %v1009_v18  ;;  %v373_v15 = vld [vmem:[%s1428_s6 + $0xe8] sm:$0xff]  ;;  %v935_v16 = vpack.c.bf16 %v355_v13, %v354_v12  ;;  %v356_v19 = vld [vmem:[%s1428_s6 + $0x60] sm:$0xff]  ;;  %v375_v22 = vld [vmem:[%s1428_s6 + $0xf8] sm:$0xff] }
  0x21   :  { %893 = vmatpush3.bf16.msra.mxu0 %v892_v10  ;;  %v931_v10 = vpack.c.bf16 %v353_v6, %v352_v5  ;;  %v937_v17 = vpack.c.bf16 %v373_v15, %v372_v14  ;;  %v358_v25 = vld [vmem:[%s1428_s6 + $0x70] sm:$0xff]  ;;  %v359_v26 = vld [vmem:[%s1428_s6 + $0x78] sm:$0xff]  ;;  %v553_v28 = vld [vmem:[%s1430_s8] sm:$0xff] }
  0x22   :  { %945 = vmatprep.subr.bf16.mxu0 %v1006_v7  ;;  %v554_v29 = vld [vmem:[%s1430_s8 + $0x8] sm:$0xff]  ;;  %v555_v31 = vld [vmem:[%s1430_s8 + $0x10] sm:$0xff] }
  0x23   :  { %826 = vmatpush3.msk.msra.mxu1 %vm269_vm5, %v258_v20  ;;  %v357_v20 = vld [vmem:[%s1428_s6 + $0x68] sm:$0xff]  ;;  %v956_v30 = vpack.c.bf16 %v554_v29, %v553_v28 }
  0x24   :  { %176 = vmatmul.mubr.f32.vlgmr.msra.gmra.mrb[0].mxu0 %v93_v44  ;;  %914 = vmatprep.subr.bf16.mxu1 %v913_v21  ;;  %v345_v44 = vld [vmem:[%s1428_s6 + $0x8] sm:$0xff]  ;;  %v374_v21 = vld [vmem:[%s1428_s6 + $0xf0] sm:$0xff]  ;;  %v939_v23 = vpack.c.bf16 %v357_v20, %v356_v19 }
  0x25   :  { %842 = vmatprep.mubr.msk.f32.mxu0 %vm1008_vm0, %v1009_v18  ;;  %947 = vmatpush3.bf16.msra.mxu0 %v946_v24  ;;  %v915_v32 = vpack.c.bf16 %v345_v44, %v344_v43  ;;  %v941_v24 = vpack.c.bf16 %v375_v22, %v374_v21 }
  0x26   :  { %948 = vmatprep.subr.bf16.mxu0 %v1006_v7 }
  0x29   :  { %950 = vmatpush3.bf16.msra.mxu0 %v949_v27  ;;  %v943_v27 = vpack.c.bf16 %v359_v26, %v358_v25 }
  0x2a   :  { %951 = vmatprep.subr.bf16.mxu0 %v1006_v7 }
  0x2d   :  { %954 = vmatpush3.bf16.msk.msra.mxu0 %vm1169_vm3, %v952_v33  ;;  %v556_v33 = vld [vmem:[%s1430_s8 + $0x18] sm:$0xff] }
  0x2e   :  { %955 = vmatprep.subr.bf16.mxu0 %v1006_v7 }
  0x30   :  { %843 = vmatmul.mubr.msk.f32.vlgmr.msra.gmra.mrb[2].mxu0 %vm104_vm4, %v403_v34  ;;  %v959_v34 = vpack.c.bf16 %v556_v33, %v555_v31 }
  0x31   :  { %859 = vmatprep.mubr.msk.f32.mxu0 %vm1008_vm0, %v1009_v18  ;;  %957 = vmatpush3.bf16.msra.mxu0 %v956_v30 }
  0x32   :  { %958 = vmatprep.subr.bf16.mxu0 %v1006_v7 }
  0x35   :  { %960 = vmatpush3.bf16.msra.mxu0 %v959_v34 }
  0x36   :  { %961 = vmatprep.subr.bf16.mxu0 %v1006_v7  ;;  %v689_v7 = vld [vmem:[%s1427_s5] ss:$0 sm:$0xff] }
  0xe9   :  { %v247_v35 = vpop.f32.mrb[0].mxu1 }
  0xea   :  { %v812_v36 = vpop.f32.mrb[1].mxu1 }
  0xeb   :  { %v558_v36 = vld [vmem:[%s1430_s8 + $0x28] sm:$0xff] }
  0xf7   :  { %v730_v37 = vpop.f32.mrb[0].mxu0 }
  0xf8   :  { %v731_v38 = vpop.f32.mrb[1].mxu0 }
  0xf9   :  { %v732_v40 = vadd.f32 %v731_v38, %v730_v37 }
  0xfb   :  { %v178_v42 = vadd.f32 %v732_v40, %v686_v39  ;;  %v559_v40 = vld [vmem:[%s1430_s8 + $0x30] sm:$0x3] }
  0xfd   :  { %v248_v47 = vadd.f32 %v247_v35, %v178_v42  ;;  %v557_v35 = vld [vmem:[%s1430_s8 + $0x20] sm:$0xff] }
  0xfe   :  { %v962_v37 = vpack.c.bf16 %v558_v36, %v557_v35 }
  0xff   :  { %v251_v49 = vmax.f32 %v248_v47, 0.0 }
 0x100   :  { %963 = vmatpush3.bf16.msra.mxu0 %v962_v37 }
 0x101   :  { %828 = vmatmul.mubr.msk.f32.vlgmr.msra.gmra.mrb[2].mxu1 %vm265_vm6, %v251_v49  ;;  %857 = vmatprep.subr.mxu0 %v1009_v18  ;;  %v692_v18 = vld [vmem:[%s1429_s7] ss:$0 sm:$0xff]  ;;  %s1011_s7 = smov [#allocation2]  }
 0x102   :  { %916 = vmatpush3.bf16.msra.mxu1 %v915_v32  ;;  %476 = vmatprep.mubr.f32.mxu1 %v404_v48 }
 0x103   :  { %918 = vmatprep.subr.bf16.mxu1 %v917_v50  ;;  %v548_v38 = vpop.f32.mrb[2].mxu0 }
 0x104   :  { %v844_v39 = vpop.f32.mrb[3].mxu0  ;;  %858 = vmatpush3.msk.msra.mxu0 %vm269_vm5, %v559_v40 }
 0x106   :  { %920 = vmatpush3.bf16.msra.mxu1 %v919_v55  ;;  %v695_v55 = vld [vmem:[%s1431_s9] ss:$0 sm:$0xff]  ;;  %s675_s9 = sshll.u32 %s1011_s7, 4  ;;  %s676_s9 = int_to_ptr.vmem [resolvable:$true] %s675_s9 }
 0x107   :  { %922 = vmatprep.subr.bf16.mxu1 %v921_v56  ;;  %s982_s20 = scalar_lea.vmem %s676_s9, 64  ;;  %p987_p1 = scmp.lt.s32.totalorder %s676_s9, %s676_s9 }
 0x108   :  { %p983_p0 = scmp.ne.s32.totalorder %s676_s9, %s982_s20  ;;  %p988_p2 = scmp.lt.s32.totalorder %s982_s20, %s982_s20 }
 0x10a   :  { %924 = vmatpush3.bf16.msra.mxu1 %v923_v61  ;;  %p989_p3 = por %p988_p2, %p987_p1 }
 0x10b   :  { %926 = vmatprep.subr.bf16.mxu1 %v925_v62 }
 0x10c   :  { %p990_p4 = pnand %p989_p3, %p983_p0 }
 0x10e   :  { %928 = vmatpush3.bf16.msra.mxu1 %v927_v3 }
 0x10f   :  { %930 = vmatprep.subr.bf16.mxu1 %v929_v4 }
 0x112   :  { %932 = vmatpush3.bf16.msra.mxu1 %v931_v10 }
 0x113   :  { %934 = vmatprep.subr.bf16.mxu1 %v933_v11 }
 0x116   :  { %936 = vmatpush3.bf16.msra.mxu1 %v935_v16 }
 0x117   :  { %938 = vmatprep.subr.bf16.mxu1 %v937_v17 }
 0x11a   :  { %940 = vmatpush3.bf16.msra.mxu1 %v939_v23 }
 0x11b   :  { %942 = vmatprep.subr.bf16.mxu1 %v941_v24 }
 0x11e   :  { %944 = vmatpush3.bf16.msra.mxu1 %v943_v27 }
 0x121   :  { %477 = vmatmul.mubr.f32.vlgmr.msra.gmra.mrb[4].mxu1 %v1273_v41 }
 0x1d4   :  { %v339_v41 = vpop.f32.mrb[2].mxu1 }
 0x1d5   :  { %v340_v42 = vadd.f32 %v689_v7, %v339_v41  ;;  %v829_v43 = vpop.f32.mrb[3].mxu1 }
 0x1d7   :  { %v643_v44 = vsel %vm642_vm7, %v340_v42, -inf }
 0x1d8   :  { %644 = vmax.xlane.f32.xlu0 %v643_v44 }
 0x1f4   :  { %v780_v45 = vpop.f32.mrb[4].mxu1 }
 0x1f5   :  { %v781_v46 = vpop.f32.mrb[5].mxu1 }
 0x1f6   :  { %v782_v47 = vadd.f32 %v781_v46, %v780_v45 }
 0x1f8   :  { %v479_v32 = vadd.f32 %v782_v47, %v692_v18 }
 0x1fa   :  { %v549_v48 = vadd.f32 %v548_v38, %v479_v32 }
 0x1fc   :  { %v552_v49 = vmax.f32 %v549_v48, 0.0 }
 0x1fe   :  { %860 = vmatmul.mubr.msk.f32.vlgmr.msra.gmra.mrb[4].mxu0 %vm265_vm6, %v552_v49 }
 0x265   :  { %v645_v50 = vpop.xlane.xlu0 %644 }
 0x266   :  { %v646_v51 = vsub.f32 %v340_v42, %v645_v50 }
 0x268   :  { %v647_v52 = vmul.f32 1.442695, %v646_v51 }
 0x26a   :  { %974 = vpow2.f32 %v647_v52 }
 0x274   :  { %v975_v53 = vpop.eup %974 }
 0x275   :  { %v649_v54 = vsel %vm642_vm7, %v975_v53, 0.0 }
 0x276   :  { %650 = vadd.xlane.f32.xlu1 %v649_v54 }
 0x2d1   :  { %v638_v56 = vpop.f32.mrb[4].mxu0 }
 0x2d2   :  { %v639_v57 = vadd.f32 %v695_v55, %v638_v56  ;;  %v861_v58 = vpop.f32.mrb[5].mxu0 }
 0x2d4   :  { %v656_v59 = vsel %vm642_vm7, %v639_v57, -inf }
 0x2d5   :  { %657 = vmax.xlane.f32.xlu0 %v656_v59 }
 0x303   :  { %v651_v60 = vpop.xlane.xlu1 %650 }
 0x304   :  { %976 = vlog2.f32 %v651_v60 }
 0x30e   :  { %v977_v61 = vpop.eup %976 }
 0x30f   :  { %v653_v62 = vmul.f32 0.6931472, %v977_v61 }
 0x311   :  { %v654_v63 = vsub.f32 %v646_v51, %v653_v62 }
 0x313   :  { %655 = vst.msk [vmem:[#allocation2] sm:$0x3] %vm642_vm7, %v654_v63 }
 0x362   :  { %v658_v0 = vpop.xlane.xlu0 %657 }
 0x363   :  { %v659_v1 = vsub.f32 %v639_v57, %v658_v0 }
 0x365   :  { %v660_v2 = vmul.f32 1.442695, %v659_v1 }
 0x367   :  { %978 = vpow2.f32 %v660_v2 }
 0x371   :  { %v979_v3 = vpop.eup %978 }
 0x372   :  { %v662_v4 = vsel %vm642_vm7, %v979_v3, 0.0 }
 0x373   :  { %663 = vadd.xlane.f32.xlu1 %v662_v4 }
 0x400   :  { %v664_v5 = vpop.xlane.xlu1 %663 }
 0x401   :  { %980 = vlog2.f32 %v664_v5 }
 0x40b   :  { %v981_v6 = vpop.eup %980 }
 0x40c   :  { %v666_v8 = vmul.f32 0.6931472, %v981_v6 }
 0x40e   :  { %v667_v9 = vsub.f32 %v659_v1, %v666_v8 }
 0x410   :  { %669 = vst.msk [vmem:[#allocation2 + $0x2] sm:$0x3] %vm642_vm7, %v667_v9 }
 0x411   :  { %993 = shalt.err (!%p990_p4)
}
 0x412   :  { %s994_s23 = scalar_lea.hbm %s1432_s10, 64 }
 0x413   :  { %p995_p5 = scmp.ne.s32.totalorder %s1432_s10, %s994_s23  ;;  %p998_p6 = scmp.lt.u32.totalorder %s994_s23, %s1432_s10 }
 0x415   :  { %p1000_p7 = pnand %p998_p6, %p995_p5 }
 0x417   :  { %1003 = shalt.err (!%p1000_p7)
}
 0x418   :  { %s1012_s27 = smov 32   ;;  %s1013_s0 = smov 2  }
 0x419   :  { %681 = dma.vmem_to_hbm [thread:$0]  %s676_s9, 64, %s1432_s10, [#allocation3], %s1012_s27, %s1012_s27, %s1013_s0  }
 0x41a   :  { %1004 = dma.done.wait [#allocation3], 64  }
 0x41b   :  { %1005 = vsyncadd [#allocation3], 4294967232 }
 0x41c   :  { %685 = vsyncpa [#allocation3], 1 }

</bundles_post_ra>
